<compile_context>
chip_gen: v6e
topology: v6e:2x2x1
jax: 0.10.0
libtpu: 0.0.40
codegen_flags: <defaults>
</compile_context>

<pallas_src>
import functools

import jax
import jax.numpy as jnp
from jax.experimental import pallas as pl
from jax.experimental.pallas import tpu as pltpu


# ----------------------------------------------------------------------------
# config (LPIPSWithDiscriminator(**config))
# ----------------------------------------------------------------------------
CFG = dict(
    disc_start=0,          # discriminator_iter_start
    logvar_init=0.0,
    kl_weight=1.0,
    pixelloss_weight=1.0,
    disc_num_layers=2,
    disc_in_channels=3,
    disc_factor=1.0,
    disc_weight=1.0,
    perceptual_weight=1.0,
    disc_loss="hinge",
)

_VMEM_LIMIT = 48 * 1024 * 1024   # safe on v5e/v6e (128 MiB) and v7x (64 MiB)


# ----------------------------------------------------------------------------
# helpers
# ----------------------------------------------------------------------------
def _vmem_specs(n):
    return [pl.BlockSpec(memory_space=pltpu.MemorySpace.VMEM) for _ in range(n)]


def _pick_row_tile(ho, wo, c, bytes_target=2 * 1024 * 1024):
    """Largest divisor of ho whose f32 row tile stays under ~2 MiB."""
    best = 1
    for th in range(1, ho + 1):
        if ho % th == 0 and th * wo * max(c, 1) * 4 <= bytes_target:
            best = th
    return best


# ----------------------------------------------------------------------------
# fused conv kernel: in-kernel patch extraction + bf16 MXU matmul + bias + act
# ----------------------------------------------------------------------------
def _conv_kernel(x_ref, w_ref, b_ref, o_ref, *, kh, kw, th, wo, cin, cout,
                 vpu_head, act):
    # x_ref: [1, Hp, Wp, Cin]  whole padded image (resident across row tiles)
    # w_ref: [KH*KW, Cin, Cout] bf16   (or [KH*KW, 1, Cin] f32 if vpu_head)
    # b_ref: [1, Cout] f32
    # o_ref: [1, TH, Wo, Cout] f32
    t = pl.program_id(1)
    h0 = t * th
    acc = jnp.zeros((th * wo, cout), jnp.float32)
    for ki in range(kh):
        for kj in range(kw):
            xwin = x_ref[0, pl.ds(h0 + ki, th), pl.ds(kj, wo), :]   # [TH, Wo, Cin]
            xmat = xwin.reshape(th * wo, cin)
            wk = w_ref[ki * kw + kj]
            if vpu_head:
                # Cout == 1: VPU multiply + cross-lane sum, skip the MXU.
                acc = acc + jnp.sum(xmat * wk, axis=-1, keepdims=True)
            else:
                acc = acc + jnp.dot(xmat.astype(jnp.bfloat16), wk,
                                    preferred_element_type=jnp.float32)
    y = acc + b_ref[...]
    if act == "relu":
        y = jnp.maximum(y, 0.0)
    elif act == "lrelu":
        y = jnp.where(y >= 0.0, y, 0.2 * y)
    o_ref[...] = y.reshape(1, th, wo, cout)


def _conv_stride1(xp, w, b, act):
    # xp: [N, Hp, Wp, Cin] already spatially padded; w: [KH, KW, Cin, Cout]
    n, hp, wp, cin = xp.shape
    kh, kw, _, cout = w.shape
    ho, wo = hp - kh + 1, wp - kw + 1
    th = _pick_row_tile(ho, wo, max(cin, cout))
    vpu_head = (cout == 1)
    if vpu_head:
        w2 = jnp.transpose(w.reshape(kh * kw, cin, cout), (0, 2, 1)).astype(jnp.float32)
        w_spec = pl.BlockSpec((kh * kw, 1, cin), lambda i, t: (0, 0, 0))
    else:
        w2 = w.reshape(kh * kw, cin, cout).astype(jnp.bfloat16)
        w_spec = pl.BlockSpec((kh * kw, cin, cout), lambda i, t: (0, 0, 0))
    b2 = b.reshape(1, cout).astype(jnp.float32)
    kern = functools.partial(_conv_kernel, kh=kh, kw=kw, th=th, wo=wo,
                             cin=cin, cout=cout, vpu_head=vpu_head, act=act)
    return pl.pallas_call(
        kern,
        out_shape=jax.ShapeDtypeStruct((n, ho, wo, cout), jnp.float32),
        grid=(n, ho // th),
        in_specs=[
            pl.BlockSpec((1, hp, wp, cin), lambda i, t: (i, 0, 0, 0)),
            w_spec,
            pl.BlockSpec((1, cout), lambda i, t: (0, 0)),
        ],
        out_specs=pl.BlockSpec((1, th, wo, cout), lambda i, t: (i, t, 0, 0)),
        compiler_params=pltpu.CompilerParams(
            dimension_semantics=("parallel", "parallel"),
            vmem_limit_bytes=_VMEM_LIMIT),
    )(xp, w2, b2)


def conv2d(x, w, b, *, stride, pad, act):
    # x: [N, H, W, Cin] (NHWC), w: [KH, KW, Cin, Cout], b: [Cout]
    n, h, wd, cin = x.shape
    kh, kw, _, cout = w.shape
    xp = jnp.pad(x, ((0, 0), (pad, pad), (pad, pad), (0, 0)))
    if stride == 1:
        return _conv_stride1(xp, w, b, act)
    if stride == 2:
        # Rewrite as a stride-1 conv on the 4-phase channel-concatenated input:
        #   out[oh,ow] = sum_{a,b,di,dj} w[2di+a,2dj+b] . xp[2(oh+di)+a, 2(ow+dj)+b]
        assert (h + 2 * pad) % 2 == 0 and (wd + 2 * pad) % 2 == 0
        assert kh % 2 == 0 and kw % 2 == 0
        phases = [xp[:, a::2, bb::2, :] for a in (0, 1) for bb in (0, 1)]
        xcat = jnp.concatenate(phases, axis=-1)               # [N, Hp/2, Wp/2, 4*Cin]
        w_r = w.reshape(kh // 2, 2, kw // 2, 2, cin, cout)    # [di, a, dj, b, c, co]
        wcat = jnp.transpose(w_r, (0, 2, 1, 3, 4, 5)).reshape(
            kh // 2, kw // 2, 4 * cin, cout)
        return _conv_stride1(xcat, wcat, b, act)
    raise ValueError("stride must be 1 or 2")


# ----------------------------------------------------------------------------
# LPIPS per-layer distance (gridded accumulator over row tiles)
# ----------------------------------------------------------------------------
def _lpips_slice_kernel(f0_ref, f1_ref, w_ref, o_ref, *, inv_hw):
    @pl.when(pl.program_id(1) == 0)
    def _():
        o_ref[...] = jnp.zeros_like(o_ref)
    f0 = f0_ref[0]                                            # [TH, W, C]
    f1 = f1_ref[0]
    n0 = f0 * pl.reciprocal(
        jnp.sqrt(jnp.sum(f0 * f0, axis=-1, keepdims=True)) + 1e-10, approx=True)
    n1 = f1 * pl.reciprocal(
        jnp.sqrt(jnp.sum(f1 * f1, axis=-1, keepdims=True)) + 1e-10, approx=True)
    d = (n0 - n1) ** 2
    v = jnp.sum(d * w_ref[...].reshape(1, 1, -1))
    o_ref[...] += jnp.reshape(v * inv_hw, (1, 1))


def lpips_slice(feats, lin_w, n_half):
    # feats: [2*n_half, H, W, C]  (x-features stacked over recon-features)
    _, h, w, c = feats.shape
    th = _pick_row_tile(h, w, c)
    kern = functools.partial(_lpips_slice_kernel, inv_hw=1.0 / float(h * w))
    return pl.pallas_call(
        kern,
        out_shape=jax.ShapeDtypeStruct((n_half, 1), jnp.float32),
        grid=(n_half, h // th),
        in_specs=[
            pl.BlockSpec((1, th, w, c), lambda i, t: (i, t, 0, 0)),
            pl.BlockSpec((1, th, w, c), lambda i, t: (i + n_half, t, 0, 0)),
            pl.BlockSpec((1, c), lambda i, t: (0, 0)),
        ],
        out_specs=pl.BlockSpec((1, 1), lambda i, t: (i, 0)),
        compiler_params=pltpu.CompilerParams(
            dimension_semantics=("parallel", "arbitrary"),
            vmem_limit_bytes=_VMEM_LIMIT),
    )(feats, feats, lin_w)


# ----------------------------------------------------------------------------
# L1 + perceptual NLL reduction (gridded over batch, accumulated output)
# ----------------------------------------------------------------------------
def _nll_kernel(x_ref, r_ref, p_ref, lv_ref, nll_ref, rec_ref, *, pw, per_sample):
    @pl.when(pl.program_id(0) == 0)
    def _():
        nll_ref[...] = jnp.zeros_like(nll_ref)
        rec_ref[...] = jnp.zeros_like(rec_ref)
    rec_abs = jnp.sum(jnp.abs(x_ref[...] - r_ref[...]))
    rec_tot = jnp.reshape(rec_abs, (1, 1)) + pw * per_sample * p_ref[...]
    lv = lv_ref[...]
    nll_tot = rec_tot * jnp.exp(-lv) + lv * per_sample
    rec_ref[...] += rec_tot
    nll_ref[...] += nll_tot


def nll_reduce(x, r, p_loss, logvar, pw):
    n, h, w, c = x.shape
    kern = functools.partial(_nll_kernel, pw=pw, per_sample=float(h * w * c))
    return pl.pallas_call(
        kern,
        out_shape=(jax.ShapeDtypeStruct((1, 1), jnp.float32),
                   jax.ShapeDtypeStruct((1, 1), jnp.float32)),
        grid=(n,),
        in_specs=[
            pl.BlockSpec((1, h, w, c), lambda i: (i, 0, 0, 0)),
            pl.BlockSpec((1, h, w, c), lambda i: (i, 0, 0, 0)),
            pl.BlockSpec((1, 1), lambda i: (i, 0)),
            pl.BlockSpec((1, 1), lambda i: (0, 0)),
        ],
        out_specs=(pl.BlockSpec((1, 1), lambda i: (0, 0)),
                   pl.BlockSpec((1, 1), lambda i: (0, 0))),
        compiler_params=pltpu.CompilerParams(
            dimension_semantics=("arbitrary",),
            vmem_limit_bytes=_VMEM_LIMIT),
    )(x, r, p_loss, logvar)


# ----------------------------------------------------------------------------
# small scalar reductions (tiny inputs -> whole-block kernels)
# ----------------------------------------------------------------------------
def _kl_kernel(m_ref, lv_ref, o_ref):
    m = m_ref[...]
    lv = lv_ref[...]
    o_ref[...] = (0.5 * jnp.sum(m * m + jnp.exp(lv) - 1.0 - lv)).reshape(1, 1)


def kl_reduce(mean2, logvar2):
    return pl.pallas_call(
        _kl_kernel,
        out_shape=jax.ShapeDtypeStruct((1, 1), jnp.float32),
        in_specs=_vmem_specs(2),
        out_specs=pl.BlockSpec(memory_space=pltpu.MemorySpace.VMEM),
    )(mean2, logvar2)


def _gloss_kernel(f_ref, o_ref):
    o_ref[...] = (-jnp.mean(f_ref[...])).reshape(1, 1)


def gloss_reduce(logits_fake_flat):
    return pl.pallas_call(
        _gloss_kernel,
        out_shape=jax.ShapeDtypeStruct((1, 1), jnp.float32),
        in_specs=_vmem_specs(1),
        out_specs=pl.BlockSpec(memory_space=pltpu.MemorySpace.VMEM),
    )(logits_fake_flat)


def _hinge_kernel(r_ref, f_ref, d_ref, mr_ref, mf_ref):
    r = r_ref[...]
    f = f_ref[...]
    loss_real = jnp.mean(jnp.maximum(0.0, 1.0 - r))
    loss_fake = jnp.mean(jnp.maximum(0.0, 1.0 + f))
    d_ref[...] = (0.5 * (loss_real + loss_fake)).reshape(1, 1)
    mr_ref[...] = jnp.mean(r).reshape(1, 1)
    mf_ref[...] = jnp.mean(f).reshape(1, 1)


def hinge_reduce(logits_real_flat, logits_fake_flat):
    return pl.pallas_call(
        _hinge_kernel,
        out_shape=(jax.ShapeDtypeStruct((1, 1), jnp.float32),
                   jax.ShapeDtypeStruct((1, 1), jnp.float32),
                   jax.ShapeDtypeStruct((1, 1), jnp.float32)),
        in_specs=_vmem_specs(2),
        out_specs=tuple(_vmem_specs(3)),
    )(logits_real_flat, logits_fake_flat)


# ----------------------------------------------------------------------------
# LPIPS feature net and PatchGAN discriminator
# ----------------------------------------------------------------------------
# TODO(synk): real LPIPS uses a fixed pretrained VGG16; here a deterministic
# scaled-down 3-layer conv feature net is used (same normalize/lin/spatial-mean
# semantics per slice), since no checkpoint loading is allowed.
def lpips_distance(x, r, lpips_params):
    # Single pass over the batch-concatenated (x, r) pair; per-layer accumulate.
    n = x.shape[0]
    shift = jnp.array([-0.030, -0.088, -0.188], jnp.float32)
    scale = jnp.array([0.458, 0.448, 0.450], jnp.float32)
    h = (jnp.concatenate([x, r], axis=0) - shift) / scale
    total = jnp.zeros((n, 1), jnp.float32)
    for lyr in lpips_params:
        h = conv2d(h, lyr["w"], lyr["b"], stride=1, pad=1, act="relu")
        total = total + lpips_slice(h, lyr["lin"], n)
    return total                                             # [N, 1]


def discriminator(x, disc_params):
    # NLayerDiscriminator(n_layers=2, ndf=8); BatchNorm at fresh init in eval
    # mode is an identity and is therefore folded away.
    h = x
    for li, lyr in enumerate(disc_params):
        act = "none" if li == len(disc_params) - 1 else "lrelu"
        h = conv2d(h, lyr["w"], lyr["b"], stride=lyr["stride"], pad=1, act=act)
    return h                                                 # [N, Ho, Wo, 1]


# ----------------------------------------------------------------------------
# parameter init (deterministic)
# ----------------------------------------------------------------------------
def init_params(key):
    ks = jax.random.split(key, 24)
    i = 0

    def draw(shape, scale=0.1):
        nonlocal i
        out = scale * jax.random.normal(ks[i], shape, jnp.float32)
        i += 1
        return out

    params = {"lpips": [], "disc": []}
    for cin, cout in [(3, 8), (8, 16), (16, 32)]:
        params["lpips"].append({
            "w": draw((3, 3, cin, cout)),
            "b": draw((cout,)),
            "lin": jnp.abs(draw((1, cout))),                 # LPIPS 1x1 lin layer
        })
    ndf = 8
    for cin, cout, stride in [(3, ndf, 2), (ndf, 2 * ndf, 2),
                              (2 * ndf, 4 * ndf, 1), (4 * ndf, 1, 1)]:
        params["disc"].append({
            "w": draw((4, 4, cin, cout)),
            "b": draw((cout,)),
            "stride": stride,
        })
    params["logvar"] = jnp.full((1, 1), CFG["logvar_init"], jnp.float32)
    return params


# ----------------------------------------------------------------------------
# lpipsWithDisc.forward
# ----------------------------------------------------------------------------
def lpips_with_disc_forward(params, inputs, reconstructions, posterior_parameters,
                            optimizer_idx, global_step, mask=None, last_layer=None,
                            split="train"):
    # inputs / reconstructions: NCHW float32 (PyTorch convention)
    x = jnp.transpose(inputs, (0, 2, 3, 1)).astype(jnp.float32)        # -> NHWC
    r = jnp.transpose(reconstructions, (0, 2, 3, 1)).astype(jnp.float32)
    n = x.shape[0]
    numel = x.shape[0] * x.shape[1] * x.shape[2] * x.shape[3]

    # DiagonalGaussianDistribution posterior
    mean, logvar_z = jnp.split(posterior_parameters, 2, axis=1)
    logvar_z = jnp.clip(logvar_z, -30.0, 20.0)
    kl_sum = kl_reduce(mean.reshape(n, -1), logvar_z.reshape(n, -1))
    kl_loss = kl_sum[0, 0] / n

    # reconstruction + perceptual NLL
    p_loss = lpips_distance(x, r, params["lpips"])                      # [N, 1]
    nll_sum, rec_sum = nll_reduce(x, r, p_loss, params["logvar"],
                                  CFG["perceptual_weight"])
    nll_loss = nll_sum[0, 0] / n
    weighted_nll_loss = nll_loss
    rec_mean = rec_sum[0, 0] / numel
    # TODO(synk): mask-weighted NLL path not implemented (mask semantics not in reference).

    disc_factor = CFG["disc_factor"] if global_step >= CFG["disc_start"] else 0.0

    if optimizer_idx == 0:
        # generator update
        logits_fake = discriminator(r, params["disc"])
        g_loss = gloss_reduce(logits_fake.reshape(n, -1))[0, 0]
        # TODO(synk): adaptive d_weight needs ||grad(nll)||/||grad(g_loss)|| wrt last_layer;
        # forward-only path mirrors the no-grad exception branch -> d_weight = 0.0.
        d_weight = jnp.asarray(0.0, jnp.float32)
        loss = (weighted_nll_loss + CFG["kl_weight"] * kl_loss
                + d_weight * disc_factor * g_loss)
        log = {
            f"{split}/total_loss": loss,
            f"{split}/logvar": params["logvar"][0, 0],
            f"{split}/kl_loss": kl_loss,
            f"{split}/nll_loss": nll_loss,
            f"{split}/rec_loss": rec_mean,
            f"{split}/d_weight": d_weight,
            f"{split}/disc_factor": jnp.asarray(disc_factor, jnp.float32),
            f"{split}/g_loss": g_loss,
        }
        return [loss, log]

    if optimizer_idx == 1:
        # discriminator update (hinge loss); single pass over concat([x, r])
        logits = discriminator(jnp.concatenate([x, r], axis=0), params["disc"])
        logits_real = logits[:n].reshape(n, -1)
        logits_fake = logits[n:].reshape(n, -1)
        d_raw, mr, mf = hinge_reduce(logits_real, logits_fake)
        d_loss = disc_factor * d_raw[0, 0]
        log = {
            f"{split}/disc_loss": d_loss,
            f"{split}/logits_real": mr[0, 0],
            f"{split}/logits_fake": mf[0, 0],
        }
        return [d_loss, log]

    raise ValueError("optimizer_idx must be 0 or 1")


# ----------------------------------------------------------------------------
if __name__ == "__main__":
    key = jax.random.PRNGKey(0)
    k1, k2, k3 = jax.random.split(key, 3)

    N, C, H, W = 2, 3, 16, 16          # images (NCHW at the API boundary)
    zC, zH, zW = 4, 4, 4               # latent posterior spatial size

    inputs = jax.random.normal(k1, (N, C, H, W), jnp.float32)
    reconstructions = jax.random.normal(k2, (N, C, H, W), jnp.float32)
    posterior_parameters = jax.random.normal(k3, (N, 2 * zC, zH, zW), jnp.float32)

    params = init_params(jax.random.PRNGKey(42))

    # generator branch
    loss, loss_dict = lpips_with_disc_forward(
        params, inputs, reconstructions, posterior_parameters,
        optimizer_idx=0, global_step=10, split="train")
    jax.block_until_ready(loss)
    jax.block_until_ready(loss_dict)

    # discriminator branch
    d_loss, d_dict = lpips_with_disc_forward(
        params, inputs, reconstructions, posterior_parameters,
        optimizer_idx=1, global_step=10, split="train")
    jax.block_until_ready(d_loss)
    jax.block_until_ready(d_dict)

    print("KERNEL_OK")
</pallas_src>

<mosaic_0001>
module attributes {stable_mosaic.version = 11 : i64} {
  func.func @_kl_kernel(%arg0: memref<2x64xf32, #tpu.memory_space<vmem>>, %arg1: memref<2x64xf32, #tpu.memory_space<vmem>>, %arg2: memref<1x1xf32, #tpu.memory_space<vmem>>) attributes {dimension_semantics = [], scalar_prefetch = 0 : i64, scratch_operands = 0 : i64, tpu.core_type = #tpu.core_type<tc>} {
    %c0 = arith.constant 0 : index
    %c0_0 = arith.constant 0 : index
    %0 = vector.load %arg0[%c0, %c0_0] : memref<2x64xf32, #tpu.memory_space<vmem>>, vector<2x64xf32>
    %c0_1 = arith.constant 0 : index
    %c0_2 = arith.constant 0 : index
    %1 = vector.load %arg1[%c0_1, %c0_2] : memref<2x64xf32, #tpu.memory_space<vmem>>, vector<2x64xf32>
    %2 = arith.mulf %0, %0 : vector<2x64xf32>
    %3 = math.exp %1 : vector<2x64xf32>
    %4 = arith.addf %2, %3 : vector<2x64xf32>
    %cst = arith.constant 1.000000e+00 : f32
    %5 = vector.broadcast %cst : f32 to vector<2x64xf32>
    %6 = arith.subf %4, %5 : vector<2x64xf32>
    %7 = arith.subf %6, %1 : vector<2x64xf32>
    %8 = vector.shape_cast %7 : vector<2x64xf32> to vector<1x2x64xf32>
    %cst_3 = arith.constant dense<0.000000e+00> : vector<1xf32>
    %9 = vector.multi_reduction <add>, %8, %cst_3 [1, 2] : vector<1x2x64xf32> to vector<1xf32>
    %10 = vector.shape_cast %9 : vector<1xf32> to vector<1x1x1xf32>
    %11 = vector.extract %10[0, 0, 0] : f32 from vector<1x1x1xf32>
    %cst_4 = arith.constant 5.000000e-01 : f32
    %12 = arith.mulf %cst_4, %11 : f32
    %13 = vector.broadcast %12 : f32 to vector<1x1xf32>
    %c0_5 = arith.constant 0 : index
    %c0_6 = arith.constant 0 : index
    %14 = vector.load %arg2[%c0_5, %c0_6] : memref<1x1xf32, #tpu.memory_space<vmem>>, vector<1x1xf32>
    tpu.vector_store %arg2[%c0_5, %c0_6], %13 {strides = array<i32>} : memref<1x1xf32, #tpu.memory_space<vmem>>, vector<1x1xf32>,
    return
  }
}

</mosaic_0001>

<bundles_post_ra>
// kernel: tpu_custom_call.1
= control target key start
LH: loop header
LB: loop body
LE: loop exit
PB: predicated region body
PF: predicated region fallthrough
CT: control target
= control target key end

     0   :  { %7 = vsyncpa [#allocation3], 0  ;;  %s176_s0 = inlined_call_operand.hbm [shape: f32[2,64], index: 0, kind: input, shape index: {}]   ;;  %s177_s1 = inlined_call_operand.hbm [shape: f32[2,64], index: 1, kind: input, shape index: {}]   ;;  %s178_s2 = inlined_call_operand.hbm [shape: f32[1,1], index: 2, kind: output, shape index: {}]  }
   0x1   :  { %8 = vsyncpa [#allocation6], 0 }
   0x2   :  { %9 = vsyncpa [#allocation4], 0  ;;  %s149_s9 = smov [#allocation2]   ;;  %s150_s11 = smov [#allocation5]  }
   0x3   :  { %s16_s10 = sshll.u32 %s149_s9, 4  ;;  %s26_s12 = sshll.u32 %s150_s11, 4  ;;  %s17_s10 = int_to_ptr.vmem [resolvable:$true] %s16_s10  ;;  %s27_s12 = int_to_ptr.vmem [resolvable:$true] %s26_s12 }
   0x4   :  { %s91_s13 = scalar_lea.vmem %s17_s10, 32  ;;  %p96_p1 = scmp.lt.s32.totalorder %s17_s10, %s17_s10 }
   0x5   :  { %p92_p0 = scmp.ne.s32.totalorder %s17_s10, %s91_s13  ;;  %p97_p2 = scmp.lt.s32.totalorder %s91_s13, %s91_s13 }
   0x7   :  { %p98_p3 = por %p97_p2, %p96_p1 }
   0x9   :  { %p99_p4 = pnand %p98_p3, %p92_p0 }
   0xb   :  { %102 = shalt.err (!%p99_p4)
}
   0xc   :  { %19 = dma.hbm_to_vmem [thread:$0]  %s176_s0, 32, %s17_s10, [#allocation3]  }
   0xd   :  { %s111_s16 = scalar_lea.vmem %s27_s12, 32  ;;  %p116_p6 = scmp.lt.s32.totalorder %s27_s12, %s27_s12 }
   0xe   :  { %p112_p5 = scmp.ne.s32.totalorder %s27_s12, %s111_s16  ;;  %p117_p7 = scmp.lt.s32.totalorder %s111_s16, %s111_s16 }
  0x10   :  { %p118_p8 = por %p117_p7, %p116_p6 }
  0x12   :  { %p119_p9 = pnand %p118_p8, %p112_p5 }
  0x14   :  { %122 = shalt.err (!%p119_p9)
}
  0x15   :  { %29 = dma.hbm_to_vmem [thread:$0]  %s177_s1, 32, %s27_s12, [#allocation6]  }
  0x16   :  { %143 = dma.done.wait [#allocation3], 32  }
  0x17   :  { %144 = vsyncadd [#allocation3], 4294967264 }
  0x18   :  { %145 = dma.done.wait [#allocation6], 32  }
  0x19   :  { %146 = vsyncadd [#allocation6], 4294967264  ;;  %v37_v0 = vld [vmem:[#allocation5] sm:$0x3]  ;;  %v36_v2 = vld [vmem:[#allocation2] sm:$0x3] }
  0x1a   :  { %v39_v1 = vmul.f32 1.442695, %v37_v0  ;;  %v38_v3 = vmul.f32 %v36_v2, %v36_v2  ;;  %vm44_vm0 = vcmask 517120   ;;  %s151_s0 = smov [#allocation7]   ;;  %vm57_vm1 = vcmask 0  }
  0x1b   :  { %s65_s1 = sshll.u32 %s151_s0, 4  ;;  %s66_s1 = int_to_ptr.vmem [resolvable:$true] %s65_s1 }
  0x1c   :  { %81 = vpow2.f32 %v39_v1  ;;  %s123_s21 = scalar_lea.vmem %s66_s1, 16  ;;  %s127_s22 = scalar_lea.vmem %s66_s1, 32 }
  0x1d   :  { %p124_p10 = scmp.ne.s32.totalorder %s66_s1, %s123_s21  ;;  %p128_p11 = scmp.lt.s32.totalorder %s66_s1, %s66_s1 }
  0x1e   :  { %p129_p12 = scmp.lt.s32.totalorder %s127_s22, %s123_s21 }
  0x20   :  { %p130_p13 = por %p129_p12, %p128_p11 }
  0x22   :  { %p131_p0 = pnand %p130_p13, %p124_p10 }
  0x29   :  { %v82_v4 = vpop.eup %81 }
  0x2a   :  { %v41_v5 = vadd.f32 %v82_v4, %v38_v3 }
  0x2c   :  { %v75_v6 = vadd.f32 -1.0, %v41_v5 }
  0x2e   :  { %v43_v7 = vsub.f32 %v75_v6, %v37_v0 }
  0x30   :  { %v45_v8 = vsel %vm44_vm0, %v43_v7, 0.0 }
  0x31   :  { %46 = vadd.xlane.f32.xlu0 %v45_v8 }
  0xba   :  { %v47_v9 = vpop.xlane.xlu0 %46 }
  0xbb   :  { %v48_v10 = vrot.slane %v47_v9, 4 }
  0xbd   :  { %v49_v11 = vadd.f32 %v48_v10, %v47_v9 }
  0xbf   :  { %v50_v12 = vrot.slane %v49_v11, 2 }
  0xc1   :  { %v51_v13 = vadd.f32 %v50_v12, %v49_v11 }
  0xc3   :  { %v52_v14 = vrot.slane %v51_v13, 1 }
  0xc5   :  { %v53_v15 = vadd.f32 %v52_v14, %v51_v13 }
  0xc7   :  { %76 = vpush %v53_v15 }
  0xf8   :  { %s77_s19 = spop %76 }
  0xf9   :  { %s55_s20 = smul.f32 0.5, %s77_s19 }
  0xfb   :  { %v56_v16 = vstv %s55_s20 }
  0xfc   :  { %58 = vst.msk [vmem:[#allocation7] sm:$0x1] %vm57_vm1, %v56_v16 }
  0xfd   :  { %134 = shalt.err (!%p131_p0)
}
  0xfe   :  { %68 = dma.vmem_to_hbm [thread:$0]  %s66_s1, 16, %s178_s2, [#allocation4]  }
  0xff   :  { %147 = dma.done.wait [#allocation4], 16  }
 0x100   :  { %148 = vsyncadd [#allocation4], 4294967280 }
 0x101   :  { %72 = vsyncpa [#allocation3], 1 }
 0x102   :  { %73 = vsyncpa [#allocation6], 1 }
 0x103   :  { %74 = vsyncpa [#allocation4], 1 }

</bundles_post_ra>
